<compile_context>
chip_gen: v7x
topology: tpu7x:2x2x1
jax: 0.10.0
libtpu: 0.0.40
codegen_flags: <defaults>
</compile_context>

<pallas_src>
import functools

import jax
import jax.numpy as jnp
from jax import lax
from jax.experimental import pallas as pl
from jax.experimental.pallas import tpu as pltpu


# ----------------------------------------------------------------------------
# Kernels
# ----------------------------------------------------------------------------
def _causal_conv1d_kernel(x_ref, w_ref, b_ref, o_ref, carry_ref=None, *,
                          K, dilation, pad, Hc, TL, Bt, compute_dtype):
    """One (batch-group, L-tile) grid step, NCL layout (L on the lane axis).

    x_ref:     (Bt, C_in, TL)     main input tile (input dtype)
    w_ref:     (K, C_out, C_in)   weight, one (C_out, C_in) matrix per tap
    b_ref:     (C_out, 1)         f32 bias
    o_ref:     (Bt, C_out, TL)    output tile
    carry_ref: (Bt, C_in, Hc)     carried causal left context (absent if pad==0)
    """
    li = pl.program_id(1)

    if pad > 0:
        # The implicit functional.pad(input, (pad, 0)) zeros: reset the carried
        # halo at the start of every batch row's L sweep.
        @pl.when(li == 0)
        def _zero_carry():
            carry_ref[...] = jnp.zeros_like(carry_ref)

    bias = b_ref[...]                                          # (C_out, 1) f32

    for bt in range(Bt):
        x = x_ref[bt].astype(compute_dtype)                    # (C_in, TL)

        # Newest tap (j = K-1) needs no lane shift at all.
        acc = jnp.dot(w_ref[K - 1], x, preferred_element_type=jnp.float32)

        if pad > 0:
            halo = carry_ref[bt]                               # (C_in, Hc)
            for j in range(K - 1):
                s = pad - j * dilation                         # causal left shift
                # Single inherent lane shift per shifted tap: prepend only the
                # s-wide halo strip to an aligned prefix of the main tile.
                # No full-tile pre-shifted x_full, no materialized im2col.
                tap = jnp.concatenate([halo[:, Hc - s:], x[:, :TL - s]], axis=-1)
                acc = acc + jnp.dot(w_ref[j], tap,
                                    preferred_element_type=jnp.float32)
            # This tile's tail becomes the next L tile's causal context.
            carry_ref[bt] = x[:, TL - Hc:]

        o_ref[bt] = (acc + bias).astype(o_ref.dtype)


def _taps_matmul_kernel(t_ref, w_ref, b_ref, o_ref, *, K, compute_dtype):
    """stride > 1 fallback: taps are host-decimated, kernel is matmul-only.

    t_ref: (1, K, C_in, L_out); w_ref: (K, C_out, C_in); o_ref: (1, C_out, L_out)
    """
    bias = b_ref[...]
    acc = jnp.dot(w_ref[0], t_ref[0, 0].astype(compute_dtype),
                  preferred_element_type=jnp.float32)
    for j in range(1, K):
        acc = acc + jnp.dot(w_ref[j], t_ref[0, j].astype(compute_dtype),
                            preferred_element_type=jnp.float32)
    o_ref[0] = (acc + bias).astype(o_ref.dtype)


# ----------------------------------------------------------------------------
# Tiling / VMEM budgeting helpers
# ----------------------------------------------------------------------------
def _physical_vmem_bytes():
    try:
        cap = int(getattr(pltpu.get_tpu_info(), "vmem_capacity_bytes", 0))
        if cap > 0:
            return cap
    except Exception:
        pass
    return 64 << 20        # conservative default: v7x has the smallest VMEM/TC


def _estimate_vmem_bytes(Bt, TL, C_in, C_out, K, Hc, in_buffers, wi):
    io = (in_buffers * Bt * C_in * TL + 2 * Bt * C_out * TL) * 4   # pipelined IO (f32)
    wgt = 2 * (K * C_out * C_in * wi + C_out * 4)                  # resident weight + bias
    carry = Bt * C_in * Hc * wi                                    # carried halo scratch
    tmp = min(Bt, 2) * (2 * C_in * TL * wi + 2 * C_out * TL * 4)   # in-kernel temporaries
    return io + wgt + carry + tmp


def _select_tiling(L, B, C_in, C_out, K, pad, budget, in_buffers, wi):
    """Pick (TL, Lp, Bt, Hc) under TPU layout + VMEM constraints."""
    Hc = 128 * (-(-pad // 128)) if pad > 0 else 0
    if C_out >= 256 or B == 1:
        bt_cands = [1]
    else:
        # Amortize per-step overhead for narrow-channel convs, but try to keep
        # >= 2 batch groups so the "parallel" axis still feeds v7x megacore.
        max_bt = B if B < 4 else B // 2
        bt_cands = [bt for bt in (8, 4, 2, 1) if bt <= max_bt and B % bt == 0] or [1]

    for TL in (2048, 1024, 512, 256, 128):
        if TL < max(Hc, 128):
            continue
        Lp = -(-L // TL) * TL
        if TL != 128 and (Lp - L) * 8 > Lp:      # cap right-pad waste at 12.5%
            continue
        for Bt in bt_cands:
            if _estimate_vmem_bytes(Bt, TL, C_in, C_out, K, Hc,
                                    in_buffers, wi) <= budget:
                return TL, Lp, Bt, Hc
    # Always-legal fallback: smallest 128-aligned tile wide enough for the halo.
    # TODO(synk): pathological (K-1)*dilation > 2048 configs are untuned here.
    TL = max(128, Hc)
    return TL, -(-L // TL) * TL, 1, Hc


# ----------------------------------------------------------------------------
# Wrappers
# ----------------------------------------------------------------------------
def _causal_conv1d_strided(x, w2, b2, *, K, stride, dilation, pad, L_out,
                           compute_dtype, phys, wi):
    # TODO(synk): tile L_out / group batch rows here if stride>1 convs get hot;
    # this path keeps strided lane slices out of the kernel by decimating the
    # K taps on the host (polyphase), so in-kernel work is matmul-only.
    B, C_in, _ = x.shape
    C_out = w2.shape[1]
    xp = jnp.pad(x, ((0, 0), (0, 0), (pad, 0))) if pad > 0 else x
    span = (L_out - 1) * stride + 1
    taps = jnp.stack(
        [lax.slice(xp, (0, 0, j * dilation), (B, C_in, j * dilation + span),
                   (1, 1, stride)) for j in range(K)],
        axis=1)                                                # (B, K, C_in, L_out)

    est = 2 * (K * C_in + C_out) * L_out * 4 + 2 * K * C_out * C_in * wi
    vmem_limit = int(min(max(2 * est + (8 << 20), 32 << 20), phys * 3 // 4))

    kernel = functools.partial(_taps_matmul_kernel, K=K,
                               compute_dtype=compute_dtype)
    return pl.pallas_call(
        kernel,
        out_shape=jax.ShapeDtypeStruct((B, C_out, L_out), x.dtype),
        grid_spec=pltpu.PrefetchScalarGridSpec(
            num_scalar_prefetch=0,
            grid=(B,),
            in_specs=[pl.BlockSpec((1, K, C_in, L_out), lambda b: (b, 0, 0, 0)),
                      pl.BlockSpec((K, C_out, C_in), lambda b: (0, 0, 0)),
                      pl.BlockSpec((C_out, 1), lambda b: (0, 0))],
            out_specs=pl.BlockSpec((1, C_out, L_out), lambda b: (b, 0, 0)),
        ),
        compiler_params=pltpu.CompilerParams(
            dimension_semantics=("parallel",),
            vmem_limit_bytes=vmem_limit,
        ),
    )(taps, w2, b2)


def causal_conv1d(x, weight, bias, *, stride=1, dilation=1,
                  compute_dtype=jnp.bfloat16, input_buffers=2):
    """Equivalent of CausalConv1d.forward, NCL in / NCL out.

    x:      (B, C_in, L)       input activations
    weight: (C_out, C_in, K)   PyTorch Conv1d weight layout
    bias:   (C_out,)
    compute_dtype: matmul operand dtype fed to the MXU (f32 accumulate);
        pass jnp.float32 when closer-to-PyTorch-f32 parity matters.
    input_buffers: >2 requests deeper input pipelining (sweep for
        bandwidth-bound configs; check the VMEM budget).
    """
    B, C_in, L = x.shape
    C_out, C_in_w, K = weight.shape
    assert C_in_w == C_in, (C_in_w, C_in)
    pad = (K - 1) * dilation
    L_out = (L - 1) // stride + 1

    wi = jnp.dtype(compute_dtype).itemsize
    w2 = jnp.transpose(weight, (2, 0, 1)).astype(compute_dtype)   # (K, C_out, C_in)
    b2 = bias.reshape(C_out, 1).astype(jnp.float32)

    phys = _physical_vmem_bytes()
    budget = int(phys * 0.55)

    if stride != 1:
        return _causal_conv1d_strided(
            x, w2, b2, K=K, stride=stride, dilation=dilation, pad=pad,
            L_out=L_out, compute_dtype=compute_dtype, phys=phys, wi=wi)

    TL, Lp, Bt, Hc = _select_tiling(L, B, C_in, C_out, K, pad, budget,
                                    input_buffers, wi)
    num_tiles = Lp // TL
    # Ragged / short sequences: right-pad to a tile multiple on the host
    # (zeros; causal outputs < L are unaffected and the tail is sliced off).
    xp = x if Lp == L else jnp.pad(x, ((0, 0), (0, 0), (0, Lp - L)))

    est = _estimate_vmem_bytes(Bt, TL, C_in, C_out, K, Hc, input_buffers, wi)
    vmem_limit = int(min(max(est + (8 << 20), 32 << 20), phys * 3 // 4))

    x_index = lambda b, li: (b, 0, li)
    if input_buffers > 2:
        x_spec = pl.BlockSpec((Bt, C_in, TL), x_index,
                              pipeline_mode=pl.Buffered(input_buffers))
    else:
        x_spec = pl.BlockSpec((Bt, C_in, TL), x_index)
    w_spec = pl.BlockSpec((K, C_out, C_in), lambda b, li: (0, 0, 0))   # VMEM-resident
    b_spec = pl.BlockSpec((C_out, 1), lambda b, li: (0, 0))
    out_spec = pl.BlockSpec((Bt, C_out, TL), lambda b, li: (b, 0, li))

    scratch = [pltpu.VMEM((Bt, C_in, Hc), compute_dtype)] if pad > 0 else []

    kernel = functools.partial(
        _causal_conv1d_kernel, K=K, dilation=dilation, pad=pad, Hc=Hc,
        TL=TL, Bt=Bt, compute_dtype=compute_dtype)

    out = pl.pallas_call(
        kernel,
        out_shape=jax.ShapeDtypeStruct((B, C_out, Lp), x.dtype),
        grid_spec=pltpu.PrefetchScalarGridSpec(
            num_scalar_prefetch=0,
            grid=(B // Bt, num_tiles),
            in_specs=[x_spec, w_spec, b_spec],
            out_specs=out_spec,
            scratch_shapes=scratch,
        ),
        compiler_params=pltpu.CompilerParams(
            # L must be "arbitrary": the causal halo is carried across L tiles
            # in VMEM scratch (free on single-TC v5e/v6e; batch keeps megacore
            # parallelism on v7x).
            dimension_semantics=("parallel", "arbitrary"),
            vmem_limit_bytes=vmem_limit,
        ),
    )(xp, w2, b2)

    return out if Lp == L_out else out[:, :, :L_out]


# ----------------------------------------------------------------------------
# Reference + self-test
# ----------------------------------------------------------------------------
def _reference(x, weight, bias, *, stride=1, dilation=1):
    """Pure-JAX reference matching torch CausalConv1d (f32 math)."""
    K = weight.shape[-1]
    pad = (K - 1) * dilation
    y = lax.conv_general_dilated(
        x, weight, window_strides=(stride,), padding=((pad, 0),),
        rhs_dilation=(dilation,), dimension_numbers=("NCH", "OIH", "NCH"),
        precision=lax.Precision.HIGHEST)
    return y + bias.reshape(1, -1, 1)


def _check(out, x, weight, bias, *, stride, dilation, tag, exact_tol=None):
    ref = _reference(x, weight, bias, stride=stride, dilation=dilation)
    assert out.shape == ref.shape, (tag, out.shape, ref.shape)
    if exact_tol is not None:
        err = float(jnp.max(jnp.abs(out - ref)))
        assert jnp.allclose(out, ref, atol=exact_tol, rtol=exact_tol), (tag, err)
        return
    # bf16-fed MXU with f32 accumulation: compare tightly against a reference
    # with identically bf16-rounded inputs, loosely against the exact one.
    x_q = x.astype(jnp.bfloat16).astype(jnp.float32)
    w_q = weight.astype(jnp.bfloat16).astype(jnp.float32)
    ref_q = _reference(x_q, w_q, bias, stride=stride, dilation=dilation)
    err_q = float(jnp.max(jnp.abs(out - ref_q)))
    assert jnp.allclose(out, ref_q, atol=2e-3, rtol=2e-3), (tag, err_q)
    err = float(jnp.max(jnp.abs(out - ref)))
    assert jnp.allclose(out, ref, atol=2e-1, rtol=2e-1), (tag, err)


if __name__ == "__main__":
    key = jax.random.PRNGKey(0)

    def make_case(k, B, C_in, C_out, L, K):
        kx, kw, kb = jax.random.split(k, 3)
        xv = jax.random.normal(kx, (B, C_in, L), dtype=jnp.float32)
        bound = 1.0 / float((C_in * K) ** 0.5)
        wv = jax.random.uniform(kw, (C_out, C_in, K), jnp.float32, -bound, bound)
        bv = jax.random.uniform(kb, (C_out,), jnp.float32, -bound, bound)
        return xv, wv, bv

    k0, k1, k2 = jax.random.split(key, 3)

    # 1) Spec-sized case: batch=2, in_channels=4, out_channels=8, seq=16, K=3.
    x, w, b = make_case(k0, 2, 4, 8, 16, 3)
    out = jax.block_until_ready(causal_conv1d(x, w, b))
    _check(out, x, w, b, stride=1, dilation=1, tag="small_bf16")

    #    Same case through the f32 matmul path (semantics / compile check).
    out = jax.block_until_ready(causal_conv1d(x, w, b, compute_dtype=jnp.float32))
    _check(out, x, w, b, stride=1, dilation=1, tag="small_f32", exact_tol=1e-2)

    # 2) Multi-tile case exercising the carried-halo handoff, dilation and Bt.
    x, w, b = make_case(k1, 2, 8, 16, 4096, 3)
    out = jax.block_until_ready(causal_conv1d(x, w, b, dilation=2))
    _check(out, x, w, b, stride=1, dilation=2, tag="tiled_bf16")

    # 3) stride > 1 through the host-decimated taps path.
    x, w, b = make_case(k2, 2, 4, 8, 16, 3)
    out = jax.block_until_ready(causal_conv1d(x, w, b, stride=2))
    _check(out, x, w, b, stride=2, dilation=1, tag="strided_bf16")

    print("KERNEL_OK")
</pallas_src>

<mosaic_0001>
module attributes {stable_mosaic.version = 11 : i64} {
  func.func @_causal_conv1d_kernel(%arg0: i32, %arg1: i32, %arg2: memref<2x4x128xf32, #tpu.memory_space<vmem>>, %arg3: memref<3x8x4xbf16, #tpu.memory_space<vmem>>, %arg4: memref<8x1xf32, #tpu.memory_space<vmem>>, %arg5: memref<2x8x128xf32, #tpu.memory_space<vmem>>, %arg6: memref<2x4x128xbf16, #tpu.memory_space<vmem>>) attributes {dimension_semantics = [#tpu.dimension_semantics<parallel>, #tpu.dimension_semantics<arbitrary>], iteration_bounds = array<i64: 1, 1>, scalar_prefetch = 0 : i64, scratch_operands = 1 : i64, tpu.core_type = #tpu.core_type<tc>, window_params = [{transform_indices = @transform_0, window_bounds = array<i64: 2, 4, 128>}, {pipeline_mode = #tpu.pipeline_mode<synchronous>, transform_indices = @transform_1, window_bounds = array<i64: 3, 8, 4>}, {pipeline_mode = #tpu.pipeline_mode<synchronous>, transform_indices = @transform_2, window_bounds = array<i64: 8, 1>}, {transform_indices = @transform_3, window_bounds = array<i64: 2, 8, 128>}]} {
    %c0_i32 = arith.constant 0 : i32
    %0 = arith.cmpi eq, %arg1, %c0_i32 : i32
    %1 = arith.extui %0 : i1 to i32
    %c0_i32_0 = arith.constant 0 : i32
    %2 = arith.cmpi ne, %1, %c0_i32_0 : i32
    scf.if %2 {
      %cst_47 = arith.constant 0.000000e+00 : bf16
      %64 = vector.broadcast %cst_47 : bf16 to vector<2x4x128xbf16>
      %c0_48 = arith.constant 0 : index
      %c0_49 = arith.constant 0 : index
      %c0_50 = arith.constant 0 : index
      %65 = vector.load %arg6[%c0_48, %c0_49, %c0_50] : memref<2x4x128xbf16, #tpu.memory_space<vmem>>, vector<2x4x128xbf16>
      tpu.vector_store %arg6[%c0_48, %c0_49, %c0_50], %64 {strides = array<i32>} : memref<2x4x128xbf16, #tpu.memory_space<vmem>>, vector<2x4x128xbf16>,
    } else {
    }
    %c0 = arith.constant 0 : index
    %c0_1 = arith.constant 0 : index
    %3 = vector.load %arg4[%c0, %c0_1] : memref<8x1xf32, #tpu.memory_space<vmem>>, vector<8x1xf32>
    %c0_2 = arith.constant 0 : index
    %c0_3 = arith.constant 0 : index
    %c0_4 = arith.constant 0 : index
    %4 = vector.load %arg2[%c0_2, %c0_3, %c0_4] : memref<2x4x128xf32, #tpu.memory_space<vmem>>, vector<1x4x128xf32>
    %5 = vector.shape_cast %4 : vector<1x4x128xf32> to vector<4x128xf32>
    %6 = arith.truncf %5 : vector<4x128xf32> to vector<4x128xbf16>
    %c2 = arith.constant 2 : index
    %c0_5 = arith.constant 0 : index
    %c0_6 = arith.constant 0 : index
    %7 = vector.load %arg3[%c2, %c0_5, %c0_6] : memref<3x8x4xbf16, #tpu.memory_space<vmem>>, vector<1x8x4xbf16>
    %8 = vector.shape_cast %7 : vector<1x8x4xbf16> to vector<8x4xbf16>
    %cst = arith.constant dense<0.000000e+00> : vector<8x128xf32>
    %9 = tpu.matmul %8, %6, %cst {dimension_numbers = #tpu.dot_dimension_numbers<[1], [0], [0], [1], [0, 0, 1, 1], [], []>} : vector<8x4xbf16>, vector<4x128xbf16>, vector<8x128xf32> -> vector<8x128xf32>
    %c0_7 = arith.constant 0 : index
    %c0_8 = arith.constant 0 : index
    %c0_9 = arith.constant 0 : index
    %10 = vector.load %arg6[%c0_7, %c0_8, %c0_9] : memref<2x4x128xbf16, #tpu.memory_space<vmem>>, vector<1x4x128xbf16>
    %11 = vector.shape_cast %10 : vector<1x4x128xbf16> to vector<4x128xbf16>
    %12 = vector.extract_strided_slice %11 {offsets = [0, 126], sizes = [4, 2], strides = [1, 1]} : vector<4x128xbf16> to vector<4x2xbf16>
    %13 = vector.extract_strided_slice %6 {offsets = [0, 0], sizes = [4, 126], strides = [1, 1]} : vector<4x128xbf16> to vector<4x126xbf16>
    %14 = tpu.concatenate %12, %13 in 1 : vector<4x2xbf16>, vector<4x126xbf16> -> vector<4x128xbf16>
    %c0_10 = arith.constant 0 : index
    %c0_11 = arith.constant 0 : index
    %c0_12 = arith.constant 0 : index
    %15 = vector.load %arg3[%c0_10, %c0_11, %c0_12] : memref<3x8x4xbf16, #tpu.memory_space<vmem>>, vector<1x8x4xbf16>
    %16 = vector.shape_cast %15 : vector<1x8x4xbf16> to vector<8x4xbf16>
    %cst_13 = arith.constant dense<0.000000e+00> : vector<8x128xf32>
    %17 = tpu.matmul %16, %14, %cst_13 {dimension_numbers = #tpu.dot_dimension_numbers<[1], [0], [0], [1], [0, 0, 1, 1], [], []>} : vector<8x4xbf16>, vector<4x128xbf16>, vector<8x128xf32> -> vector<8x128xf32>
    %18 = arith.addf %9, %17 : vector<8x128xf32>
    %19 = vector.extract_strided_slice %11 {offsets = [0, 127], sizes = [4, 1], strides = [1, 1]} : vector<4x128xbf16> to vector<4x1xbf16>
    %20 = vector.extract_strided_slice %6 {offsets = [0, 0], sizes = [4, 127], strides = [1, 1]} : vector<4x128xbf16> to vector<4x127xbf16>
    %21 = tpu.concatenate %19, %20 in 1 : vector<4x1xbf16>, vector<4x127xbf16> -> vector<4x128xbf16>
    %c1 = arith.constant 1 : index
    %c0_14 = arith.constant 0 : index
    %c0_15 = arith.constant 0 : index
    %22 = vector.load %arg3[%c1, %c0_14, %c0_15] : memref<3x8x4xbf16, #tpu.memory_space<vmem>>, vector<1x8x4xbf16>
    %23 = vector.shape_cast %22 : vector<1x8x4xbf16> to vector<8x4xbf16>
    %cst_16 = arith.constant dense<0.000000e+00> : vector<8x128xf32>
    %24 = tpu.matmul %23, %21, %cst_16 {dimension_numbers = #tpu.dot_dimension_numbers<[1], [0], [0], [1], [0, 0, 1, 1], [], []>} : vector<8x4xbf16>, vector<4x128xbf16>, vector<8x128xf32> -> vector<8x128xf32>
    %25 = arith.addf %18, %24 : vector<8x128xf32>
    %c0_17 = arith.constant 0 : index
    %c0_18 = arith.constant 0 : index
    %c0_19 = arith.constant 0 : index
    %26 = vector.load %arg6[%c0_17, %c0_18, %c0_19] : memref<2x4x128xbf16, #tpu.memory_space<vmem>>, vector<1x4x128xbf16>
    %27 = vector.shape_cast %26 : vector<1x4x128xbf16> to vector<4x128xbf16>
    %28 = vector.shape_cast %6 : vector<4x128xbf16> to vector<1x4x128xbf16>
    tpu.vector_store %arg6[%c0_17, %c0_18, %c0_19], %28 {strides = array<i32>} : memref<2x4x128xbf16, #tpu.memory_space<vmem>>, vector<1x4x128xbf16>,
    %29 = vector.broadcast %3 : vector<8x1xf32> to vector<8x128xf32>
    %30 = arith.addf %25, %29 : vector<8x128xf32>
    %c0_20 = arith.constant 0 : index
    %c0_21 = arith.constant 0 : index
    %c0_22 = arith.constant 0 : index
    %31 = vector.load %arg5[%c0_20, %c0_21, %c0_22] : memref<2x8x128xf32, #tpu.memory_space<vmem>>, vector<1x8x128xf32>
    %32 = vector.shape_cast %31 : vector<1x8x128xf32> to vector<8x128xf32>
    %33 = vector.shape_cast %30 : vector<8x128xf32> to vector<1x8x128xf32>
    tpu.vector_store %arg5[%c0_20, %c0_21, %c0_22], %33 {strides = array<i32>} : memref<2x8x128xf32, #tpu.memory_space<vmem>>, vector<1x8x128xf32>,
    %c1_23 = arith.constant 1 : index
    %c0_24 = arith.constant 0 : index
    %c0_25 = arith.constant 0 : index
    %34 = vector.load %arg2[%c1_23, %c0_24, %c0_25] : memref<2x4x128xf32, #tpu.memory_space<vmem>>, vector<1x4x128xf32>
    %35 = vector.shape_cast %34 : vector<1x4x128xf32> to vector<4x128xf32>
    %36 = arith.truncf %35 : vector<4x128xf32> to vector<4x128xbf16>
    %c2_26 = arith.constant 2 : index
    %c0_27 = arith.constant 0 : index
    %c0_28 = arith.constant 0 : index
    %37 = vector.load %arg3[%c2_26, %c0_27, %c0_28] : memref<3x8x4xbf16, #tpu.memory_space<vmem>>, vector<1x8x4xbf16>
    %38 = vector.shape_cast %37 : vector<1x8x4xbf16> to vector<8x4xbf16>
    %cst_29 = arith.constant dense<0.000000e+00> : vector<8x128xf32>
    %39 = tpu.matmul %38, %36, %cst_29 {dimension_numbers = #tpu.dot_dimension_numbers<[1], [0], [0], [1], [0, 0, 1, 1], [], []>} : vector<8x4xbf16>, vector<4x128xbf16>, vector<8x128xf32> -> vector<8x128xf32>
    %c1_30 = arith.constant 1 : index
    %c0_31 = arith.constant 0 : index
    %c0_32 = arith.constant 0 : index
    %40 = vector.load %arg6[%c1_30, %c0_31, %c0_32] : memref<2x4x128xbf16, #tpu.memory_space<vmem>>, vector<1x4x128xbf16>
    %41 = vector.shape_cast %40 : vector<1x4x128xbf16> to vector<4x128xbf16>
    %42 = vector.extract_strided_slice %41 {offsets = [0, 126], sizes = [4, 2], strides = [1, 1]} : vector<4x128xbf16> to vector<4x2xbf16>
    %43 = vector.extract_strided_slice %36 {offsets = [0, 0], sizes = [4, 126], strides = [1, 1]} : vector<4x128xbf16> to vector<4x126xbf16>
    %44 = tpu.concatenate %42, %43 in 1 : vector<4x2xbf16>, vector<4x126xbf16> -> vector<4x128xbf16>
    %c0_33 = arith.constant 0 : index
    %c0_34 = arith.constant 0 : index
    %c0_35 = arith.constant 0 : index
    %45 = vector.load %arg3[%c0_33, %c0_34, %c0_35] : memref<3x8x4xbf16, #tpu.memory_space<vmem>>, vector<1x8x4xbf16>
    %46 = vector.shape_cast %45 : vector<1x8x4xbf16> to vector<8x4xbf16>
    %cst_36 = arith.constant dense<0.000000e+00> : vector<8x128xf32>
    %47 = tpu.matmul %46, %44, %cst_36 {dimension_numbers = #tpu.dot_dimension_numbers<[1], [0], [0], [1], [0, 0, 1, 1], [], []>} : vector<8x4xbf16>, vector<4x128xbf16>, vector<8x128xf32> -> vector<8x128xf32>
    %48 = arith.addf %39, %47 : vector<8x128xf32>
    %49 = vector.extract_strided_slice %41 {offsets = [0, 127], sizes = [4, 1], strides = [1, 1]} : vector<4x128xbf16> to vector<4x1xbf16>
    %50 = vector.extract_strided_slice %36 {offsets = [0, 0], sizes = [4, 127], strides = [1, 1]} : vector<4x128xbf16> to vector<4x127xbf16>
    %51 = tpu.concatenate %49, %50 in 1 : vector<4x1xbf16>, vector<4x127xbf16> -> vector<4x128xbf16>
    %c1_37 = arith.constant 1 : index
    %c0_38 = arith.constant 0 : index
    %c0_39 = arith.constant 0 : index
    %52 = vector.load %arg3[%c1_37, %c0_38, %c0_39] : memref<3x8x4xbf16, #tpu.memory_space<vmem>>, vector<1x8x4xbf16>
    %53 = vector.shape_cast %52 : vector<1x8x4xbf16> to vector<8x4xbf16>
    %cst_40 = arith.constant dense<0.000000e+00> : vector<8x128xf32>
    %54 = tpu.matmul %53, %51, %cst_40 {dimension_numbers = #tpu.dot_dimension_numbers<[1], [0], [0], [1], [0, 0, 1, 1], [], []>} : vector<8x4xbf16>, vector<4x128xbf16>, vector<8x128xf32> -> vector<8x128xf32>
    %55 = arith.addf %48, %54 : vector<8x128xf32>
    %c1_41 = arith.constant 1 : index
    %c0_42 = arith.constant 0 : index
    %c0_43 = arith.constant 0 : index
    %56 = vector.load %arg6[%c1_41, %c0_42, %c0_43] : memref<2x4x128xbf16, #tpu.memory_space<vmem>>, vector<1x4x128xbf16>
    %57 = vector.shape_cast %56 : vector<1x4x128xbf16> to vector<4x128xbf16>
    %58 = vector.shape_cast %36 : vector<4x128xbf16> to vector<1x4x128xbf16>
    tpu.vector_store %arg6[%c1_41, %c0_42, %c0_43], %58 {strides = array<i32>} : memref<2x4x128xbf16, #tpu.memory_space<vmem>>, vector<1x4x128xbf16>,
    %59 = vector.broadcast %3 : vector<8x1xf32> to vector<8x128xf32>
    %60 = arith.addf %55, %59 : vector<8x128xf32>
    %c1_44 = arith.constant 1 : index
    %c0_45 = arith.constant 0 : index
    %c0_46 = arith.constant 0 : index
    %61 = vector.load %arg5[%c1_44, %c0_45, %c0_46] : memref<2x8x128xf32, #tpu.memory_space<vmem>>, vector<1x8x128xf32>
    %62 = vector.shape_cast %61 : vector<1x8x128xf32> to vector<8x128xf32>
    %63 = vector.shape_cast %60 : vector<8x128xf32> to vector<1x8x128xf32>
    tpu.vector_store %arg5[%c1_44, %c0_45, %c0_46], %63 {strides = array<i32>} : memref<2x8x128xf32, #tpu.memory_space<vmem>>, vector<1x8x128xf32>,
    return
  }
  func.func @transform_0(%arg0: i32, %arg1: i32) -> (i32, i32, i32) {
    %c0_i32 = arith.constant 0 : i32
    %c0_i32_0 = arith.constant 0 : i32
    return %arg0, %c0_i32, %arg1 : i32, i32, i32
  }
  func.func @transform_1(%arg0: i32, %arg1: i32) -> (i32, i32, i32) {
    %c0_i32 = arith.constant 0 : i32
    %c0_i32_0 = arith.constant 0 : i32
    %c0_i32_1 = arith.constant 0 : i32
    %c0_i32_2 = arith.constant 0 : i32
    return %c0_i32, %c0_i32_0, %c0_i32_1 : i32, i32, i32
  }
  func.func @transform_2(%arg0: i32, %arg1: i32) -> (i32, i32) {
    %c0_i32 = arith.constant 0 : i32
    %c0_i32_0 = arith.constant 0 : i32
    %c0_i32_1 = arith.constant 0 : i32
    return %c0_i32, %c0_i32_0 : i32, i32
  }
  func.func @transform_3(%arg0: i32, %arg1: i32) -> (i32, i32, i32) {
    %c0_i32 = arith.constant 0 : i32
    %c0_i32_0 = arith.constant 0 : i32
    return %arg0, %c0_i32, %arg1 : i32, i32, i32
  }
}

</mosaic_0001>

<bundles_post_ra>
// kernel: tpu_custom_call.1
= control target key start
LH: loop header
LB: loop body
LE: loop exit
PB: predicated region body
PF: predicated region fallthrough
CT: control target
= control target key end

     0   :  { %vm50_vm0 = vcmask 1041408   ;;  %v485_v2 = vmov 0   ;;  %v486_v3 = vmov 0.0   ;;  %s487_s14 = smov 1   ;;  %vm488_vm1 = vmmov 0   ;;  %s584_s0 = inlined_call_operand.vmem [shape: f32[2,4,128], index: 0, kind: input, shape index: {}]   ;;  %s585_s1 = inlined_call_operand.vmem [shape: bf16[3,8,4], index: 1, kind: input, shape index: {}]   ;;  %s586_s2 = inlined_call_operand.vmem [shape: f32[8,1], index: 2, kind: input, shape index: {}]   ;;  %s587_s3 = inlined_call_operand.hbm [shape: f32[2,8,128], index: 3, kind: output, shape index: {}]  }
   0x1   :  { %v23_v0 = vld [vmem:[%s584_s0] sm:$0xf]  ;;  %20 = vst [vmem:[#allocation2] sm:$0x3] %v485_v2  ;;  %21 = vst [vmem:[#allocation2 + $0x2] sm:$0x3] %v485_v2  ;;  %460 = vset.pattern.permute.xlu0 %v485_v2  ;;  %416 = vmatprep.subr.bf16.mxu0 %v486_v3 }
   0x2   :  { %v24_v1 = vpack.c.bf16 %v23_v0, %v23_v0  ;;  %422 = vmatprep.subr.bf16.mxu1 %v486_v3  ;;  %418 = vmatprep.mubr.msk.bf16.mxu0 %vm488_vm1, %v486_v3 }
   0x4   :  { %141 = vrot.lane.b32.xlu1 %v24_v1, %s487_s14  ;;  %v97_v4 = vsel %vm50_vm0, %v24_v1, 0 }
   0x5   :  { %8 = vsyncpa [#allocation4], 0  ;;  %423 = vmatpush3.bf16.msra.mxu1 %v97_v4  ;;  %424 = vmatprep.mubr.msk.bf16.mxu1 %vm488_vm1, %v486_v3  ;;  %v391_v5 = vld [vmem:[%s585_s1 + $0x8] sm:$0xf]  ;;  %vm46_vm2 = vcmask 31744   ;;  %s489_s19 = smov 2  }
   0x6   :  { %v397_v6 = vld [vmem:[%s584_s0 + $0x4] sm:$0xf]  ;;  %434 = vmatprep.subr.bf16.mxu1 %v486_v3  ;;  %vm41_vm3 = vcmask 15360   ;;  %vm143_vm4 = vcmask 7168   ;;  %v45_v19 = vld [vmem:[%s585_s1] sm:$0xf] }
   0x7   :  { %v205_v8 = vpack.c.bf16 %v397_v6, %v397_v6  ;;  %v22_v10 = vld [vmem:[%s586_s2] sm:$0xff]  ;;  %v398_v32 = vld [vmem:[%s585_s1 + $0x8] sm:$0xf] }
   0x8   :  { %425 = vmatmul.mubr.msk.bf16.vlgmr.msra.gmra.mrb[0].mxu1 %vm46_vm2, %v391_v5  ;;  %v392_v7 = vld.sshfl [vmem:[#allocation2] sm:$0x3 pattern:$0x76325410]  ;;  %v395_v29 = vld [vmem:[%s585_s1 + $0x4] sm:$0xf] }
   0x9   :  { %436 = vmatprep.mubr.msk.bf16.mxu1 %vm488_vm1, %v486_v3  ;;  %36 = vrot.lane.b32.xlu0 %v392_v7, %s489_s19  ;;  %195 = vst [vmem:[#allocation2] sm:$0x3] %v24_v1  ;;  %v399_v9 = vld.sshfl [vmem:[#allocation2 + $0x2] sm:$0x3 pattern:$0x76325410] }
   0xa   :  { %139 = vrot.lane.b32.xlu1 %v392_v7, %s487_s14  ;;  %371 = vst [vmem:[#allocation2 + $0x2] sm:$0x3] %v205_v8  ;;  %v225_v25 = vld [vmem:[%s585_s1] sm:$0xf]  ;;  %v275_v30 = vsel %vm50_vm0, %v205_v8, 0 }
   0xb   :  { %v402_v31 = vld [vmem:[%s585_s1 + $0x4] sm:$0xf]  ;;  %s490_s1 = smov [#allocation3]  }
   0xc   :  { %s380_s30 = sshll.u32 %s490_s1, 4  ;;  %s381_s30 = int_to_ptr.vmem [resolvable:$true] %s380_s30 }
   0xd   :  { %39 = vrot.lane.b32.xlu0 %v24_v1, %s489_s19  ;;  %s461_s4 = scalar_lea.vmem %s381_s30, 256  ;;  %p466_p1 = scmp.lt.s32.totalorder %s381_s30, %s381_s30 }
   0xe   :  { %220 = vrot.lane.b32.xlu1 %v205_v8, %s489_s19  ;;  %p462_p0 = scmp.ne.s32.totalorder %s381_s30, %s461_s4  ;;  %p467_p2 = scmp.lt.s32.totalorder %s461_s4, %s461_s4 }
  0x10   :  { %p468_p3 = por %p467_p2, %p466_p1 }
  0x11   :  { %217 = vrot.lane.b32.xlu0 %v399_v9, %s489_s19 }
  0x12   :  { %319 = vrot.lane.b32.xlu1 %v205_v8, %s487_s14  ;;  %p469_p4 = pnand %p468_p3, %p462_p0 }
  0x15   :  { %317 = vrot.lane.b32.xlu0 %v399_v9, %s487_s14 }
  0x19   :  { %198 = vperm.xlu0 %460, %v22_v10  }
  0x76   :  { %v142_v11 = vpop.permute.xlu1 %141 }
  0x7b   :  { %v37_v12 = vpop.permute.xlu0 %36 }
  0x7c   :  { %v140_v13 = vpop.permute.xlu1 %139 }
  0x7d   :  { %v146_v18 = vsel %vm143_vm4, %v140_v13, %v142_v11 }
  0x7e   :  { %v152_v22 = vsel %vm50_vm0, %v146_v18, 0 }
  0x7f   :  { %v40_v14 = vpop.permute.xlu0 %39 }
  0x80   :  { %v44_v15 = vsel %vm41_vm3, %v37_v12, %v40_v14  ;;  %v221_v17 = vpop.permute.xlu1 %220 }
  0x81   :  { %v51_v16 = vsel %vm50_vm0, %v44_v15, 0 }
  0x82   :  { %417 = vmatpush3.bf16.msra.mxu0 %v51_v16 }
  0x83   :  { %428 = vmatprep.subr.bf16.mxu0 %v486_v3  ;;  %v218_v20 = vpop.permute.xlu0 %217 }
  0x84   :  { %v224_v21 = vsel %vm41_vm3, %v218_v20, %v221_v17  ;;  %v320_v24 = vpop.permute.xlu1 %319 }
  0x85   :  { %419 = vmatmul.mubr.msk.bf16.vlgmr.msra.gmra.mrb[0].mxu0 %vm46_vm2, %v45_v19  ;;  %v229_v23 = vsel %vm50_vm0, %v224_v21, 0 }
  0x86   :  { %429 = vmatpush3.bf16.msra.mxu0 %v152_v22  ;;  %435 = vmatpush3.bf16.msra.mxu1 %v229_v23 }
  0x87   :  { %430 = vmatprep.mubr.msk.bf16.mxu0 %vm488_vm1, %v486_v3  ;;  %440 = vmatprep.subr.bf16.mxu0 %v486_v3  ;;  %v318_v26 = vpop.permute.xlu0 %317 }
  0x88   :  { %v323_v27 = vsel %vm143_vm4, %v318_v26, %v320_v24  ;;  %446 = vmatprep.subr.bf16.mxu1 %v486_v3 }
  0x89   :  { %437 = vmatmul.mubr.msk.bf16.vlgmr.msra.gmra.mrb[4].mxu1 %vm46_vm2, %v225_v25  ;;  %v328_v28 = vsel %vm50_vm0, %v323_v27, 0 }
  0x8a   :  { %447 = vmatpush3.bf16.msra.mxu1 %v328_v28  ;;  %448 = vmatprep.mubr.msk.bf16.mxu1 %vm488_vm1, %v486_v3 }
  0x8d   :  { %431 = vmatmul.mubr.msk.bf16.vlgmr.msra.gmra.mrb[4].mxu0 %vm46_vm2, %v395_v29 }
  0x8e   :  { %441 = vmatpush3.bf16.msra.mxu0 %v275_v30  ;;  %442 = vmatprep.mubr.msk.bf16.mxu0 %vm488_vm1, %v486_v3 }
  0x91   :  { %449 = vmatmul.mubr.msk.bf16.vlgmr.msra.gmra.mrb[8].mxu1 %vm46_vm2, %v402_v31 }
  0x95   :  { %443 = vmatmul.mubr.msk.bf16.vlgmr.msra.gmra.mrb[8].mxu0 %vm46_vm2, %v398_v32 }
  0x98   :  { %v199_v47 = vpop.permute.xlu0 %198 }
  0xdb   :  { %v133_v33 = vpop.f32.mrb[0].mxu1 }
  0xdc   :  { %v426_v34 = vpop.f32.mrb[1].mxu1 }
  0xdd   :  { %v136_v35 = vpop.f32.mrb[2].mxu1 }
  0xde   :  { %v427_v36 = vpop.f32.mrb[3].mxu1 }
 0x158   :  { %v87_v37 = vpop.f32.mrb[0].mxu0 }
 0x159   :  { %v134_v38 = vadd.f32 %v133_v33, %v87_v37  ;;  %v420_v39 = vpop.f32.mrb[1].mxu0 }
 0x15a   :  { %v90_v40 = vpop.f32.mrb[2].mxu0 }
 0x15b   :  { %v421_v41 = vpop.f32.mrb[3].mxu0 }
 0x15c   :  { %v265_v42 = vpop.f32.mrb[4].mxu1 }
 0x15d   :  { %v438_v43 = vpop.f32.mrb[5].mxu1 }
 0x15e   :  { %v268_v44 = vpop.f32.mrb[6].mxu1 }
 0x15f   :  { %v439_v45 = vpop.f32.mrb[7].mxu1 }
 0x160   :  { %v188_v46 = vpop.f32.mrb[4].mxu0 }
 0x161   :  { %v194_v48 = vadd.f32 %v188_v46, %v134_v38  ;;  %v432_v49 = vpop.f32.mrb[5].mxu0 }
 0x162   :  { %v191_v50 = vpop.f32.mrb[6].mxu0 }
 0x163   :  { %v201_v51 = vadd.f32 %v199_v47, %v194_v48  ;;  %v433_v52 = vpop.f32.mrb[7].mxu0 }
 0x164   :  { %v364_v53 = vpop.f32.mrb[8].mxu1 }
 0x165   :  { %202 = vst [vmem:[#allocation3] sm:$0xff] %v201_v51  ;;  %v450_v54 = vpop.f32.mrb[9].mxu1 }
 0x166   :  { %v367_v55 = vpop.f32.mrb[10].mxu1 }
 0x167   :  { %v451_v56 = vpop.f32.mrb[11].mxu1 }
 0x168   :  { %v311_v57 = vpop.f32.mrb[8].mxu0 }
 0x169   :  { %v312_v58 = vadd.f32 %v311_v57, %v265_v42  ;;  %v444_v59 = vpop.f32.mrb[9].mxu0 }
 0x16a   :  { %v314_v60 = vpop.f32.mrb[10].mxu0 }
 0x16b   :  { %v370_v61 = vadd.f32 %v364_v53, %v312_v58  ;;  %v445_v62 = vpop.f32.mrb[11].mxu0 }
 0x16d   :  { %v372_v63 = vadd.f32 %v370_v61, %v199_v47 }
 0x16f   :  { %374 = vst [vmem:[#allocation3 + $0x8] sm:$0xff] %v372_v63 }
 0x170   :  { %472 = shalt.err (!%p469_p4)
}
 0x171   :  { %s473_s7 = scalar_lea.hbm %s587_s3, 256 }
 0x172   :  { %p474_p5 = scmp.ne.s32.totalorder %s587_s3, %s473_s7  ;;  %p477_p6 = scmp.lt.u32.totalorder %s473_s7, %s587_s3 }
 0x174   :  { %p479_p7 = pnand %p477_p6, %p474_p5 }
 0x176   :  { %482 = shalt.err (!%p479_p7)
}
 0x177   :  { %s491_s12 = smov 128   ;;  %s492_s13 = smov 8  }
 0x178   :  { %386 = dma.vmem_to_hbm [thread:$0]  %s381_s30, 256, %s587_s3, [#allocation4], %s491_s12, %s491_s12, %s492_s13  }
 0x179   :  { %483 = dma.done.wait [#allocation4], 256  }
 0x17a   :  { %484 = vsyncadd [#allocation4], 4294967040 }
 0x17b   :  { %390 = vsyncpa [#allocation4], 1 }

</bundles_post_ra>
